<compile_context>
chip_gen: v6e
topology: v6e:2x2x1
jax: 0.10.0
libtpu: 0.0.40
codegen_flags: <defaults>
</compile_context>

<pallas_src>
import jax
import jax.numpy as jnp
from jax.experimental import pallas as pl
from jax.experimental.pallas import tpu as pltpu

C = 16        # in_planes
TM = 512      # lane-dense row tile (each row packs 128//C points)
EPS = 1e-5


def transition_up_kernel(x_ref, bias_ref, w_ref, out_ref):
    # (TM, 128) @ (128, 128) block-diagonal weight (BN scale folded in),
    # then fused bias (b1 + segment term + BN shift, all pre-folded) + ReLU.
    z = jnp.dot(x_ref[...], w_ref[...], preferred_element_type=jnp.float32)
    out_ref[...] = jnp.maximum(z + bias_ref[...], 0.0)


def transition_up(x, o, params, tm=TM):
    """x: (N, C) float32 point features, o: (B,) int32 cumulative segment offsets.

    Requires o to be sorted cumulative offsets with o[-1] == N.
    """
    N, c = x.shape
    B = o.shape[0]
    assert 128 % c == 0, "channel count must divide 128 for lane-dense packing"
    pack = 128 // c                                   # points per lane-dense row

    # ---- glue: ragged per-segment mean (dynamic reduction stays in XLA) ----
    seg_id = jnp.searchsorted(o, jnp.arange(N, dtype=o.dtype), side="right")
    starts = jnp.concatenate([jnp.zeros((1,), o.dtype), o[:-1]])
    counts = jnp.maximum(o - starts, 1).astype(x.dtype)   # guard empty segments
    sums = jax.ops.segment_sum(x, seg_id, num_segments=B)
    means = sums / counts[:, None]                         # (B, C)

    # ---- fold everything that does not depend on per-point x ---------------
    w1, b1 = params["w1"], params["b1"]          # (C, 2C), (C,)
    w2, b2 = params["w2"], params["b2"]          # (C, C),  (C,)
    gamma, beta = params["gamma"], params["beta"]
    rmean, rvar = params["rmean"], params["rvar"]
    scale = gamma / jnp.sqrt(rvar + EPS)
    shift = beta - rmean * scale

    y = jnp.maximum(means @ w2.T + b2[None, :], 0.0)       # linear2 on means (B, C)
    v = y @ w1[:, c:].T                                    # second half of linear1
    bias_seg = scale[None, :] * (b1[None, :] + v) + shift[None, :]   # (B, C)
    bias_pp = bias_seg[seg_id]                             # (N, C) per-point bias

    w_eff = w1[:, :c].T * scale[None, :]                   # (C, C), BN folded in
    w_block = jnp.kron(jnp.eye(pack, dtype=x.dtype), w_eff)  # (128, 128) block-diag

    # ---- lane-dense packing + padding (handles ragged N) --------------------
    rows = -(-N // pack)                                   # ceil(N / pack)
    tm_eff = min(tm, ((rows + 7) // 8) * 8)                # sublane-aligned tile
    rows_padded = -(-rows // tm_eff) * tm_eff
    n_padded = rows_padded * pack
    pad = n_padded - N
    if pad:
        zpad = jnp.zeros((pad, c), x.dtype)
        x_p = jnp.concatenate([x, zpad], axis=0)
        b_p = jnp.concatenate([bias_pp, zpad], axis=0)
    else:
        x_p, b_p = x, bias_pp
    x_r = x_p.reshape(rows_padded, pack * c)               # (rows, 128) lane-dense
    b_r = b_p.reshape(rows_padded, pack * c)

    # ---- Pallas call ---------------------------------------------------------
    grid = (rows_padded // tm_eff,)
    row_spec = pl.BlockSpec((tm_eff, pack * c), lambda i: (i, 0))
    w_spec = pl.BlockSpec((pack * c, pack * c), lambda i: (0, 0))

    out = pl.pallas_call(
        transition_up_kernel,
        out_shape=jax.ShapeDtypeStruct((rows_padded, pack * c), x.dtype),
        grid_spec=pltpu.PrefetchScalarGridSpec(
            num_scalar_prefetch=0,
            grid=grid,
            in_specs=[row_spec, row_spec, w_spec],
            out_specs=row_spec,
        ),
        compiler_params=pltpu.CompilerParams(
            dimension_semantics=("parallel",)),
    )(x_r, b_r, w_block)

    return out.reshape(n_padded, c)[:N]


def reference(x, o, params):
    """Pure-JAX re-implementation of the PyTorch forward (pxo2=None branch)."""
    w1, b1 = params["w1"], params["b1"]
    w2, b2 = params["w2"], params["b2"]
    gamma, beta = params["gamma"], params["beta"]
    rmean, rvar = params["rmean"], params["rvar"]
    o_list = [int(v) for v in jax.device_get(o)]
    parts, s = [], 0
    for e in o_list:
        xb = x[s:e]
        cnt = e - s
        mean = xb.sum(0, keepdims=True) / cnt
        y = jnp.maximum(mean @ w2.T + b2, 0.0)
        parts.append(jnp.concatenate([xb, jnp.tile(y, (cnt, 1))], axis=1))
        s = e
    z = jnp.concatenate(parts, axis=0) @ w1.T + b1
    z = gamma * (z - rmean) / jnp.sqrt(rvar + EPS) + beta
    return jnp.maximum(z, 0.0)


if __name__ == "__main__":
    key = jax.random.PRNGKey(0)
    ks = jax.random.split(key, 9)

    N = 64                                       # total points (two ragged segments)
    o = jnp.array([24, 64], dtype=jnp.int32)     # cumulative offsets (B=2)

    x = jax.random.normal(ks[0], (N, C), dtype=jnp.float32)

    params = {
        "w1": jax.random.normal(ks[1], (C, 2 * C), dtype=jnp.float32) * 0.1,
        "b1": jax.random.normal(ks[2], (C,), dtype=jnp.float32) * 0.1,
        "w2": jax.random.normal(ks[3], (C, C), dtype=jnp.float32) * 0.1,
        "b2": jax.random.normal(ks[4], (C,), dtype=jnp.float32) * 0.1,
        "gamma": jax.random.uniform(ks[5], (C,), jnp.float32, 0.5, 1.5),
        "beta": jax.random.normal(ks[6], (C,), dtype=jnp.float32) * 0.1,
        "rmean": jax.random.normal(ks[7], (C,), dtype=jnp.float32) * 0.1,
        "rvar": jax.random.uniform(ks[8], (C,), jnp.float32, 0.5, 1.5),
    }

    out = transition_up(x, o, params)
    out = jax.block_until_ready(out)

    ref = reference(x, o, params)
    assert out.shape == (N, C) and out.dtype == jnp.float32
    if not jnp.allclose(out, ref, atol=1e-4, rtol=1e-4):
        raise AssertionError("Pallas kernel mismatch vs reference")
    print("KERNEL_OK")
</pallas_src>

<mosaic_0001>
module attributes {stable_mosaic.version = 11 : i64} {
  func.func @transition_up_kernel(%arg0: i32, %arg1: memref<8x128xf32, #tpu.memory_space<vmem>>, %arg2: memref<8x128xf32, #tpu.memory_space<vmem>>, %arg3: memref<128x128xf32, #tpu.memory_space<vmem>>, %arg4: memref<8x128xf32, #tpu.memory_space<vmem>>) attributes {dimension_semantics = [#tpu.dimension_semantics<parallel>], iteration_bounds = array<i64: 1>, scalar_prefetch = 0 : i64, scratch_operands = 0 : i64, tpu.core_type = #tpu.core_type<tc>, window_params = [{transform_indices = @transform_0, window_bounds = array<i64: 8, 128>}, {transform_indices = @transform_1, window_bounds = array<i64: 8, 128>}, {pipeline_mode = #tpu.pipeline_mode<synchronous>, transform_indices = @transform_2, window_bounds = array<i64: 128, 128>}, {transform_indices = @transform_3, window_bounds = array<i64: 8, 128>}]} {
    %c0 = arith.constant 0 : index
    %c0_0 = arith.constant 0 : index
    %0 = vector.load %arg1[%c0, %c0_0] : memref<8x128xf32, #tpu.memory_space<vmem>>, vector<8x128xf32>
    %c0_1 = arith.constant 0 : index
    %c0_2 = arith.constant 0 : index
    %1 = vector.load %arg3[%c0_1, %c0_2] : memref<128x128xf32, #tpu.memory_space<vmem>>, vector<128x128xf32>
    %cst = arith.constant dense<0.000000e+00> : vector<8x128xf32>
    %2 = tpu.matmul %0, %1, %cst {dimension_numbers = #tpu.dot_dimension_numbers<[1], [0], [0], [1], [0, 0, 1, 1], [], []>} : vector<8x128xf32>, vector<128x128xf32>, vector<8x128xf32> -> vector<8x128xf32>
    %c0_3 = arith.constant 0 : index
    %c0_4 = arith.constant 0 : index
    %3 = vector.load %arg2[%c0_3, %c0_4] : memref<8x128xf32, #tpu.memory_space<vmem>>, vector<8x128xf32>
    %4 = arith.addf %2, %3 : vector<8x128xf32>
    %cst_5 = arith.constant 0.000000e+00 : f32
    %5 = vector.broadcast %cst_5 : f32 to vector<8x128xf32>
    %6 = arith.maximumf %4, %5 : vector<8x128xf32>
    %c0_6 = arith.constant 0 : index
    %c0_7 = arith.constant 0 : index
    %7 = vector.load %arg4[%c0_6, %c0_7] : memref<8x128xf32, #tpu.memory_space<vmem>>, vector<8x128xf32>
    tpu.vector_store %arg4[%c0_6, %c0_7], %6 {strides = array<i32>} : memref<8x128xf32, #tpu.memory_space<vmem>>, vector<8x128xf32>,
    return
  }
  func.func @transform_0(%arg0: i32) -> (i32, i32) {
    %c0_i32 = arith.constant 0 : i32
    %c0_i32_0 = arith.constant 0 : i32
    return %arg0, %c0_i32 : i32, i32
  }
  func.func @transform_1(%arg0: i32) -> (i32, i32) {
    %c0_i32 = arith.constant 0 : i32
    %c0_i32_0 = arith.constant 0 : i32
    return %arg0, %c0_i32 : i32, i32
  }
  func.func @transform_2(%arg0: i32) -> (i32, i32) {
    %c0_i32 = arith.constant 0 : i32
    %c0_i32_0 = arith.constant 0 : i32
    %c0_i32_1 = arith.constant 0 : i32
    return %c0_i32, %c0_i32_0 : i32, i32
  }
  func.func @transform_3(%arg0: i32) -> (i32, i32) {
    %c0_i32 = arith.constant 0 : i32
    %c0_i32_0 = arith.constant 0 : i32
    return %arg0, %c0_i32 : i32, i32
  }
}

</mosaic_0001>

<bundles_post_ra>
// kernel: tpu_custom_call.1
= control target key start
LH: loop header
LB: loop body
LE: loop exit
PB: predicated region body
PF: predicated region fallthrough
CT: control target
= control target key end

     0   :  { %8 = vsyncpa [#allocation3], 0  ;;  %s344_s0 = inlined_call_operand.hbm [shape: f32[8,128], index: 0, kind: input, shape index: {}]   ;;  %s345_s1 = inlined_call_operand.hbm [shape: f32[8,128], index: 1, kind: input, shape index: {}]   ;;  %s346_s2 = inlined_call_operand.hbm [shape: f32[128,128], index: 2, kind: input, shape index: {}]   ;;  %s347_s3 = inlined_call_operand.hbm [shape: f32[8,128], index: 3, kind: output, shape index: {}]  }
   0x1   :  { %9 = vsyncpa [#allocation6], 0 }
   0x2   :  { %10 = vsyncpa [#allocation4], 0  ;;  %s304_s12 = smov [#allocation5]   ;;  %s305_s14 = smov [#allocation2]  }
   0x3   :  { %s27_s13 = sshll.u32 %s304_s12, 4  ;;  %s17_s15 = sshll.u32 %s305_s14, 4  ;;  %s28_s13 = int_to_ptr.vmem [resolvable:$true] %s27_s13  ;;  %s18_s15 = int_to_ptr.vmem [resolvable:$true] %s17_s15 }
   0x4   :  { %s226_s16 = scalar_lea.vmem %s28_s13, 128  ;;  %p231_p1 = scmp.lt.s32.totalorder %s28_s13, %s28_s13 }
   0x5   :  { %p227_p0 = scmp.ne.s32.totalorder %s28_s13, %s226_s16  ;;  %p232_p2 = scmp.lt.s32.totalorder %s226_s16, %s226_s16 }
   0x7   :  { %p233_p3 = por %p232_p2, %p231_p1 }
   0x9   :  { %p234_p4 = pnand %p233_p3, %p227_p0 }
   0xb   :  { %237 = shalt.err (!%p234_p4)
}
   0xc   :  { %30 = dma.hbm_to_vmem [thread:$0]  %s345_s1, 128, %s28_s13, [#allocation6]  }
   0xd   :  { %s246_s19 = scalar_lea.vmem %s18_s15, 128  ;;  %p251_p6 = scmp.lt.s32.totalorder %s18_s15, %s18_s15 }
   0xe   :  { %p247_p5 = scmp.ne.s32.totalorder %s18_s15, %s246_s19  ;;  %p252_p7 = scmp.lt.s32.totalorder %s246_s19, %s246_s19 }
  0x10   :  { %p253_p8 = por %p252_p7, %p251_p6 }
  0x12   :  { %p254_p9 = pnand %p253_p8, %p247_p5 }
  0x14   :  { %257 = shalt.err (!%p254_p9)
}
  0x15   :  { %20 = dma.hbm_to_vmem [thread:$0]  %s344_s0, 128, %s18_s15, [#allocation3]  }
  0x16   :  { %s306_s22 = smov [#allocation7]  }
  0x17   :  { %s36_s23 = sshll.u32 %s306_s22, 4  ;;  %s37_s23 = int_to_ptr.vmem [resolvable:$true] %s36_s23 }
  0x18   :  { %s266_s24 = scalar_lea.vmem %s37_s23, 2048  ;;  %p271_p11 = scmp.lt.s32.totalorder %s37_s23, %s37_s23 }
  0x19   :  { %p267_p10 = scmp.ne.s32.totalorder %s37_s23, %s266_s24  ;;  %p272_p12 = scmp.lt.s32.totalorder %s266_s24, %s266_s24 }
  0x1b   :  { %p273_p13 = por %p272_p12, %p271_p11 }
  0x1d   :  { %p274_p0 = pnand %p273_p13, %p267_p10 }
  0x1f   :  { %277 = shalt.err (!%p274_p0)
}
  0x20   :  { %s307_s1 = smov 128   ;;  %s308_s25 = smov 8  }
  0x21   :  { %42 = dma.hbm_to_vmem [thread:$0]  %s346_s2, 2048, %s37_s23, [#allocation6], %s307_s1, %s307_s1, %s308_s25  }
  0x22   :  { %298 = dma.done.wait [#allocation3], 128  }
  0x23   :  { %299 = vsyncadd [#allocation3], 4294967168 }
  0x24   :  { %300 = dma.done.wait [#allocation6], 2176  }
  0x25   :  { %301 = vsyncadd [#allocation6], 4294965120  ;;  %v309_v0 = vmov 0.0   ;;  %vm310_vm0 = vmmov 0   ;;  %v68_v1 = vld [vmem:[#allocation7 + $0x78] sm:$0xff]  ;;  %v67_v2 = vld [vmem:[#allocation7 + $0x70] sm:$0xff] }
  0x26   :  { %175 = vmatprep.subr.mxu0 %v309_v0  ;;  %207 = vmatprep.mubr.msk.f32.mxu0 %vm310_vm0, %v309_v0  ;;  %v66_v3 = vld [vmem:[#allocation7 + $0x68] sm:$0xff]  ;;  %v65_v4 = vld [vmem:[#allocation7 + $0x60] sm:$0xff]  ;;  %v64_v5 = vld [vmem:[#allocation7 + $0x58] sm:$0xff]  ;;  %s311_s0 = smov [#allocation8]  }
  0x27   :  { %176 = vmatpush3.msra.mxu0 %v68_v1  ;;  %v63_v6 = vld [vmem:[#allocation7 + $0x50] sm:$0xff]  ;;  %v62_v7 = vld [vmem:[#allocation7 + $0x48] sm:$0xff]  ;;  %v61_v8 = vld [vmem:[#allocation7 + $0x40] sm:$0xff]  ;;  %s148_s2 = sshll.u32 %s311_s0, 4  ;;  %s149_s2 = int_to_ptr.vmem [resolvable:$true] %s148_s2 }
  0x28   :  { %177 = vmatprep.subr.mxu0 %v309_v0  ;;  %v60_v9 = vld [vmem:[#allocation7 + $0x38] sm:$0xff]  ;;  %v59_v10 = vld [vmem:[#allocation7 + $0x30] sm:$0xff]  ;;  %v58_v11 = vld [vmem:[#allocation7 + $0x28] sm:$0xff]  ;;  %s278_s28 = scalar_lea.vmem %s149_s2, 128  ;;  %p283_p2 = scmp.lt.s32.totalorder %s149_s2, %s149_s2 }
  0x29   :  { %178 = vmatpush3.msra.mxu0 %v67_v2  ;;  %v57_v12 = vld [vmem:[#allocation7 + $0x20] sm:$0xff]  ;;  %v56_v13 = vld [vmem:[#allocation7 + $0x18] sm:$0xff]  ;;  %v55_v14 = vld [vmem:[#allocation7 + $0x10] sm:$0xff]  ;;  %p279_p1 = scmp.ne.s32.totalorder %s149_s2, %s278_s28  ;;  %p284_p3 = scmp.lt.s32.totalorder %s278_s28, %s278_s28 }
  0x2a   :  { %179 = vmatprep.subr.mxu0 %v309_v0  ;;  %v54_v15 = vld [vmem:[#allocation7 + $0x8] sm:$0xff]  ;;  %v53_v16 = vld [vmem:[#allocation7] sm:$0xff]  ;;  %v52_v17 = vld [vmem:[#allocation2] sm:$0xff] }
  0x2b   :  { %180 = vmatpush3.msra.mxu0 %v66_v3  ;;  %v69_v18 = vld [vmem:[#allocation5] sm:$0xff]  ;;  %p285_p4 = por %p284_p3, %p283_p2 }
  0x2c   :  { %181 = vmatprep.subr.mxu0 %v309_v0 }
  0x2d   :  { %182 = vmatpush3.msra.mxu0 %v65_v4  ;;  %p286_p5 = pnand %p285_p4, %p279_p1 }
  0x2e   :  { %183 = vmatprep.subr.mxu0 %v309_v0 }
  0x2f   :  { %184 = vmatpush3.msra.mxu0 %v64_v5 }
  0x30   :  { %185 = vmatprep.subr.mxu0 %v309_v0 }
  0x31   :  { %186 = vmatpush3.msra.mxu0 %v63_v6 }
  0x32   :  { %187 = vmatprep.subr.mxu0 %v309_v0 }
  0x33   :  { %188 = vmatpush3.msra.mxu0 %v62_v7 }
  0x34   :  { %189 = vmatprep.subr.mxu0 %v309_v0 }
  0x35   :  { %190 = vmatpush3.msra.mxu0 %v61_v8 }
  0x36   :  { %191 = vmatprep.subr.mxu0 %v309_v0 }
  0x37   :  { %192 = vmatpush3.msra.mxu0 %v60_v9 }
  0x38   :  { %193 = vmatprep.subr.mxu0 %v309_v0 }
  0x39   :  { %194 = vmatpush3.msra.mxu0 %v59_v10 }
  0x3a   :  { %195 = vmatprep.subr.mxu0 %v309_v0 }
  0x3b   :  { %196 = vmatpush3.msra.mxu0 %v58_v11 }
  0x3c   :  { %197 = vmatprep.subr.mxu0 %v309_v0 }
  0x3d   :  { %198 = vmatpush3.msra.mxu0 %v57_v12 }
  0x3e   :  { %199 = vmatprep.subr.mxu0 %v309_v0 }
  0x3f   :  { %200 = vmatpush3.msra.mxu0 %v56_v13 }
  0x40   :  { %201 = vmatprep.subr.mxu0 %v309_v0 }
  0x41   :  { %202 = vmatpush3.msra.mxu0 %v55_v14 }
  0x42   :  { %203 = vmatprep.subr.mxu0 %v309_v0 }
  0x43   :  { %204 = vmatpush3.msra.mxu0 %v54_v15 }
  0x44   :  { %205 = vmatprep.subr.mxu0 %v309_v0 }
  0x45   :  { %206 = vmatpush3.msra.mxu0 %v53_v16 }
  0x46   :  { %208 = vmatmul.mubr.f32.vlgmr.msra.gmra.mxu0 %v52_v17 }
 0x106   :  { %v136_v19 = vpop.f32.mrf.mxu0 }
 0x107   :  { %v137_v20 = vadd.f32 %v136_v19, %v69_v18 }
 0x108   :  { %v209_v21 = vpop.f32.mrf.mxu0 }
 0x109   :  { %v140_v22 = vmax.f32 %v137_v20, 0.0 }
 0x10b   :  { %141 = vst [vmem:[#allocation8] sm:$0xff] %v140_v22 }
 0x10c   :  { %289 = shalt.err (!%p286_p5)
}
 0x10d   :  { %151 = dma.vmem_to_hbm [thread:$0]  %s149_s2, 128, %s347_s3, [#allocation4]  }
 0x10e   :  { %302 = dma.done.wait [#allocation4], 128  }
 0x10f   :  { %303 = vsyncadd [#allocation4], 4294967168 }
 0x110   :  { %155 = vsyncpa [#allocation3], 1 }
 0x111   :  { %156 = vsyncpa [#allocation6], 1 }
 0x112   :  { %157 = vsyncpa [#allocation4], 1 }

</bundles_post_ra>
